<compile_context>
chip_gen: v7x
topology: tpu7x:2x2x1
jax: 0.10.0
libtpu: 0.0.40
codegen_flags: <defaults>
</compile_context>

<pallas_src>
from functools import partial

import numpy as np
import jax
import jax.numpy as jnp
from jax.experimental import pallas as pl
from jax.experimental.pallas import tpu as pltpu


# ---------------------------------------------------------------------------
# Fused Pallas kernel: one grid step = one sample, hidden dim processed in chunks
# ---------------------------------------------------------------------------
def _mv2_fused_kernel(x_ref, w1t_ref, b1_ref, wdw_ref, b2_ref, w3t_ref, b3_ref,
                      o_ref, *, H, W, use_res, hidden_chunk):
    HW = H * W
    hidden = w1t_ref.shape[0]
    oup = w3t_ref.shape[0]

    xb = x_ref[0]                                   # (Cin, HW), bf16, lane-dense

    # Per-pixel row / column indices on the flattened (lane) axis. Power-of-two W
    # strength-reduces div/mod to shift/and (avoids multi-op vector integer division).
    idx = jax.lax.broadcasted_iota(jnp.int32, (1, HW), 1)
    if (W & (W - 1)) == 0:
        col = idx & (W - 1)
        row = idx >> (W.bit_length() - 1)
    else:
        col = idx % W
        row = idx // W
    mask_l = col >= 1          # left  neighbour exists (dx = -1)
    mask_r = col <= W - 2      # right neighbour exists (dx = +1)
    mask_u = row >= 1          # upper neighbour exists (dy = -1)
    mask_d = row <= H - 2      # lower neighbour exists (dy = +1)

    # Small weight/bias tensors: load once, slice per hidden-chunk below.
    wdw = wdw_ref[...]                              # (9, hidden, 1) f32, BN2 scale folded
    b1 = b1_ref[...]                                # (hidden, 1) f32
    b2 = b2_ref[...]                                # (hidden, 1) f32
    w3t = w3t_ref[...]                              # (oup, hidden) bf16, BN3 scale folded

    y = jnp.zeros((oup, HW), jnp.float32)

    # Hidden-dim chunking: bounds live VMEM to ~3 chunk-sized slabs at real sizes.
    for c0 in range(0, hidden, hidden_chunk):
        c1 = c0 + hidden_chunk

        # --- 1) 1x1 expand conv (BN1 scale pre-folded into w1t) + bias + SiLU ----
        h = jnp.dot(w1t_ref[c0:c1, :], xb, preferred_element_type=jnp.float32)
        h = h + b1[c0:c1]
        h = h * jax.nn.sigmoid(h)                   # f32 elementwise (safe on v5e)

        # --- 2) depthwise 3x3 (stride 1, zero pad 1), BN2 scale folded -----------
        # dx shifts hoisted: 2 odd-lane rolls, then one +/-W roll per dy (4 rolls total).
        h_l = jnp.where(mask_l, pltpu.roll(h, shift=1, axis=1), 0.0)       # dx = -1 src
        h_r = jnp.where(mask_r, pltpu.roll(h, shift=HW - 1, axis=1), 0.0)  # dx = +1 src

        acc = None
        for dy, rmask in ((-1, mask_u), (0, None), (1, mask_d)):
            base = (dy + 1) * 3
            t = (h_l * wdw[base + 0, c0:c1]
                 + h * wdw[base + 1, c0:c1]
                 + h_r * wdw[base + 2, c0:c1])
            if dy != 0:
                t = pltpu.roll(t, shift=(-dy * W) % HW, axis=1)
                t = jnp.where(rmask, t, 0.0)
            acc = t if acc is None else acc + t
        acc = acc + b2[c0:c1]
        acc = acc * jax.nn.sigmoid(acc)

        # --- 3) 1x1 project conv (BN3 scale folded), K-blocked over hidden -------
        y = y + jnp.dot(w3t[:, c0:c1], acc.astype(w3t.dtype),
                        preferred_element_type=jnp.float32)

    y = y + b3_ref[...]
    if use_res:
        y = y + xb.astype(jnp.float32)              # residual from already-loaded input
    o_ref[0] = y.astype(o_ref.dtype)


# ---------------------------------------------------------------------------
# One-time parameter preparation: BN folding + transposes + dtype casts
# ---------------------------------------------------------------------------
def prepare_mv2_params(params, compute_dtype=jnp.bfloat16):
    hidden = params["w1"].shape[1]
    oup = params["w3"].shape[1]
    # Fold eval-mode BN scales directly into the conv weights (biases stay separate).
    w1t = (params["w1"] * params["s1"][None, :]).T.astype(compute_dtype)      # (hidden, Cin)
    w3t = (params["w3"] * params["s3"][None, :]).T.astype(compute_dtype)      # (oup, hidden)
    wdw = (params["wdw"] * params["s2"][None, None, :]).reshape(9, hidden, 1) # (9, hidden, 1)
    return dict(
        w1t=w1t,
        b1=params["b1"].reshape(hidden, 1).astype(jnp.float32),
        wdw=wdw.astype(jnp.float32),
        b2=params["b2"].reshape(hidden, 1).astype(jnp.float32),
        w3t=w3t,
        b3=params["b3"].reshape(oup, 1).astype(jnp.float32),
        use_res=bool(params["use_res"]),
    )


# ---------------------------------------------------------------------------
# Wrapper: layout plumbing only (reshape + bf16 cast; no transposes per call)
# ---------------------------------------------------------------------------
def mv2_block_forward(x_nchw, prep, *, compute_dtype=jnp.bfloat16):
    N, Cin, H, W = x_nchw.shape
    HW = H * W
    hidden = prep["w1t"].shape[0]
    oup = prep["w3t"].shape[0]

    if hidden % 256 == 0:
        hidden_chunk = 256
    elif hidden % 128 == 0:
        hidden_chunk = 128
    else:
        hidden_chunk = hidden

    x = x_nchw.reshape(N, Cin, HW).astype(compute_dtype)   # NCHW kept; spatial on lanes

    kern = partial(_mv2_fused_kernel, H=H, W=W,
                   use_res=prep["use_res"], hidden_chunk=hidden_chunk)
    y = pl.pallas_call(
        kern,
        out_shape=jax.ShapeDtypeStruct((N, oup, HW), compute_dtype),
        grid=(N,),
        in_specs=[
            pl.BlockSpec((1, Cin, HW), lambda n: (n, 0, 0)),
            pl.BlockSpec((hidden, Cin), lambda n: (0, 0)),
            pl.BlockSpec((hidden, 1), lambda n: (0, 0)),
            pl.BlockSpec((9, hidden, 1), lambda n: (0, 0, 0)),
            pl.BlockSpec((hidden, 1), lambda n: (0, 0)),
            pl.BlockSpec((oup, hidden), lambda n: (0, 0)),
            pl.BlockSpec((oup, 1), lambda n: (0, 0)),
        ],
        out_specs=pl.BlockSpec((1, oup, HW), lambda n: (n, 0, 0)),
        compiler_params=pltpu.CompilerParams(
            dimension_semantics=(pltpu.PARALLEL,),
            vmem_limit_bytes=32 * 1024 * 1024,   # TODO(synk): size from band/chunk tiles at real shapes
        ),
    )(x, prep["w1t"], prep["b1"], prep["wdw"], prep["b2"], prep["w3t"], prep["b3"])
    return y.reshape(N, oup, H, W)


# ---------------------------------------------------------------------------
# Pure-JAX f32 reference (same math, no Pallas) for verification
# ---------------------------------------------------------------------------
def mv2_block_reference(x_nchw, params):
    x = jnp.transpose(x_nchw, (0, 2, 3, 1)).astype(jnp.float32)
    h = jnp.einsum("nhwc,co->nhwo", x, params["w1"], precision="highest")
    h = h * params["s1"] + params["b1"]
    h = h * jax.nn.sigmoid(h)
    N, H, W, C = h.shape
    hp = jnp.pad(h, ((0, 0), (1, 1), (1, 1), (0, 0)))
    acc = jnp.zeros_like(h)
    for dy in range(3):
        for dx in range(3):
            acc = acc + hp[:, dy:dy + H, dx:dx + W, :] * params["wdw"][dy, dx]
    acc = acc * params["s2"] + params["b2"]
    acc = acc * jax.nn.sigmoid(acc)
    y = jnp.einsum("nhwc,co->nhwo", acc, params["w3"], precision="highest")
    y = y * params["s3"] + params["b3"]
    if params["use_res"]:
        y = y + x
    return jnp.transpose(y, (0, 3, 1, 2))


# ---------------------------------------------------------------------------
if __name__ == "__main__":
    key = jax.random.PRNGKey(0)
    k = jax.random.split(key, 16)

    inp, oup, stride, expansion = 4, 4, 1, 4
    hidden = inp * expansion
    N, H, W = 2, 16, 16

    def bn_fold(kg, kb, km, kv, C):
        gamma = 1.0 + 0.1 * jax.random.normal(kg, (C,), jnp.float32)
        beta = 0.1 * jax.random.normal(kb, (C,), jnp.float32)
        mean = 0.1 * jax.random.normal(km, (C,), jnp.float32)
        var = 1.0 + 0.1 * jnp.abs(jax.random.normal(kv, (C,), jnp.float32))
        scale = gamma * jax.lax.rsqrt(var + 1e-5)
        return scale, beta - mean * scale

    # Deterministic synthetic parameters (PyTorch conv weights in matmul layout).
    w1 = 0.3 * jax.random.normal(k[0], (inp, hidden), jnp.float32)     # 1x1: (Cin, hidden)
    wdw = 0.3 * jax.random.normal(k[1], (3, 3, hidden), jnp.float32)   # depthwise taps
    w3 = 0.3 * jax.random.normal(k[2], (hidden, oup), jnp.float32)     # 1x1: (hidden, oup)
    s1, b1 = bn_fold(k[3], k[4], k[5], k[6], hidden)
    s2, b2 = bn_fold(k[7], k[8], k[9], k[10], hidden)
    s3, b3 = bn_fold(k[11], k[12], k[13], k[14], oup)

    params = dict(w1=w1, s1=s1, b1=b1, wdw=wdw, s2=s2, b2=b2,
                  w3=w3, s3=s3, b3=b3,
                  use_res=(stride == 1 and inp == oup))
    prep = prepare_mv2_params(params, compute_dtype=jnp.bfloat16)      # done once

    x = jax.random.normal(k[15], (N, inp, H, W), jnp.float32)          # NCHW, like PyTorch

    out = jax.block_until_ready(mv2_block_forward(x, prep))
    ref = jax.block_until_ready(mv2_block_reference(x, params))

    assert out.shape == (N, oup, H, W), out.shape
    # Tolerance sized for bf16 HBM I/O + bf16 MXU operands with f32 accumulation.
    np.testing.assert_allclose(np.asarray(out.astype(jnp.float32)), np.asarray(ref),
                               rtol=3e-2, atol=3e-2)
    print("KERNEL_OK")
</pallas_src>

<mosaic_0001>
module attributes {stable_mosaic.version = 11 : i64} {
  func.func @_mv2_fused_kernel(%arg0: i32, %arg1: memref<1x4x256xbf16, #tpu.memory_space<vmem>>, %arg2: memref<16x4xbf16, #tpu.memory_space<vmem>>, %arg3: memref<16x1xf32, #tpu.memory_space<vmem>>, %arg4: memref<9x16x1xf32, #tpu.memory_space<vmem>>, %arg5: memref<16x1xf32, #tpu.memory_space<vmem>>, %arg6: memref<4x16xbf16, #tpu.memory_space<vmem>>, %arg7: memref<4x1xf32, #tpu.memory_space<vmem>>, %arg8: memref<1x4x256xbf16, #tpu.memory_space<vmem>>) attributes {dimension_semantics = [#tpu.dimension_semantics<parallel>], iteration_bounds = array<i64: 2>, scalar_prefetch = 0 : i64, scratch_operands = 0 : i64, tpu.core_type = #tpu.core_type<tc>, window_params = [{transform_indices = @transform_0, window_bounds = array<i64: 1, 4, 256>}, {pipeline_mode = #tpu.pipeline_mode<synchronous>, transform_indices = @transform_1, window_bounds = array<i64: 16, 4>}, {pipeline_mode = #tpu.pipeline_mode<synchronous>, transform_indices = @transform_2, window_bounds = array<i64: 16, 1>}, {pipeline_mode = #tpu.pipeline_mode<synchronous>, transform_indices = @transform_3, window_bounds = array<i64: 9, 16, 1>}, {pipeline_mode = #tpu.pipeline_mode<synchronous>, transform_indices = @transform_4, window_bounds = array<i64: 16, 1>}, {pipeline_mode = #tpu.pipeline_mode<synchronous>, transform_indices = @transform_5, window_bounds = array<i64: 4, 16>}, {pipeline_mode = #tpu.pipeline_mode<synchronous>, transform_indices = @transform_6, window_bounds = array<i64: 4, 1>}, {transform_indices = @transform_7, window_bounds = array<i64: 1, 4, 256>}]} {
    %c0 = arith.constant 0 : index
    %c0_0 = arith.constant 0 : index
    %c0_1 = arith.constant 0 : index
    %0 = vector.load %arg1[%c0, %c0_0, %c0_1] : memref<1x4x256xbf16, #tpu.memory_space<vmem>>, vector<1x4x256xbf16>
    %1 = vector.shape_cast %0 : vector<1x4x256xbf16> to vector<4x256xbf16>
    %2 = tpu.iota {dimensions = array<i32: 1>} : vector<1x256xi32>
    %c15_i32 = arith.constant 15 : i32
    %3 = vector.broadcast %c15_i32 : i32 to vector<1x256xi32>
    %4 = arith.andi %2, %3 : vector<1x256xi32>
    %c4_i32 = arith.constant 4 : i32
    %5 = vector.broadcast %c4_i32 : i32 to vector<1x256xi32>
    %6 = arith.shrsi %2, %5 : vector<1x256xi32>
    %c1_i32 = arith.constant 1 : i32
    %7 = vector.broadcast %c1_i32 : i32 to vector<1x256xi32>
    %8 = arith.cmpi sge, %4, %7 : vector<1x256xi32>
    %c14_i32 = arith.constant 14 : i32
    %9 = vector.broadcast %c14_i32 : i32 to vector<1x256xi32>
    %10 = arith.cmpi sle, %4, %9 : vector<1x256xi32>
    %c1_i32_2 = arith.constant 1 : i32
    %11 = vector.broadcast %c1_i32_2 : i32 to vector<1x256xi32>
    %12 = arith.cmpi sge, %6, %11 : vector<1x256xi32>
    %c14_i32_3 = arith.constant 14 : i32
    %13 = vector.broadcast %c14_i32_3 : i32 to vector<1x256xi32>
    %14 = arith.cmpi sle, %6, %13 : vector<1x256xi32>
    %c0_4 = arith.constant 0 : index
    %c0_5 = arith.constant 0 : index
    %c0_6 = arith.constant 0 : index
    %15 = vector.load %arg4[%c0_4, %c0_5, %c0_6] : memref<9x16x1xf32, #tpu.memory_space<vmem>>, vector<9x16x1xf32>
    %c0_7 = arith.constant 0 : index
    %c0_8 = arith.constant 0 : index
    %16 = vector.load %arg3[%c0_7, %c0_8] : memref<16x1xf32, #tpu.memory_space<vmem>>, vector<16x1xf32>
    %c0_9 = arith.constant 0 : index
    %c0_10 = arith.constant 0 : index
    %17 = vector.load %arg5[%c0_9, %c0_10] : memref<16x1xf32, #tpu.memory_space<vmem>>, vector<16x1xf32>
    %c0_11 = arith.constant 0 : index
    %c0_12 = arith.constant 0 : index
    %18 = vector.load %arg6[%c0_11, %c0_12] : memref<4x16xbf16, #tpu.memory_space<vmem>>, vector<4x16xbf16>
    %cst = arith.constant 0.000000e+00 : f32
    %19 = vector.broadcast %cst : f32 to vector<4x256xf32>
    %c0_13 = arith.constant 0 : index
    %c0_14 = arith.constant 0 : index
    %20 = vector.load %arg2[%c0_13, %c0_14] : memref<16x4xbf16, #tpu.memory_space<vmem>>, vector<16x4xbf16>
    %cst_15 = arith.constant dense<0.000000e+00> : vector<16x256xf32>
    %21 = tpu.matmul %20, %1, %cst_15 {dimension_numbers = #tpu.dot_dimension_numbers<[1], [0], [0], [1], [0, 0, 1, 1], [], []>} : vector<16x4xbf16>, vector<4x256xbf16>, vector<16x256xf32> -> vector<16x256xf32>
    %22 = vector.broadcast %16 : vector<16x1xf32> to vector<16x256xf32>
    %23 = arith.addf %21, %22 : vector<16x256xf32>
    %24 = arith.negf %23 : vector<16x256xf32>
    %25 = math.exp %24 : vector<16x256xf32>
    %cst_16 = arith.constant 1.000000e+00 : f32
    %26 = vector.broadcast %cst_16 : f32 to vector<16x256xf32>
    %27 = arith.addf %26, %25 : vector<16x256xf32>
    %28 = arith.divf %26, %27 : vector<16x256xf32>
    %29 = arith.mulf %23, %28 : vector<16x256xf32>
    %c1_i32_17 = arith.constant 1 : i32
    %30 = tpu.dynamic_rotate %29 by %c1_i32_17 dim 1 : vector<16x256xf32>, i32 -> vector<16x256xf32>
    %cst_18 = arith.constant 0.000000e+00 : f32
    %31 = vector.shape_cast %8 : vector<1x256xi1> to vector<1x256xi1>
    %32 = vector.broadcast %31 : vector<1x256xi1> to vector<16x256xi1>
    %33 = vector.broadcast %cst_18 : f32 to vector<16x256xf32>
    %34 = arith.select %32, %30, %33 : vector<16x256xi1>, vector<16x256xf32>
    %c255_i32 = arith.constant 255 : i32
    %35 = tpu.dynamic_rotate %29 by %c255_i32 dim 1 : vector<16x256xf32>, i32 -> vector<16x256xf32>
    %cst_19 = arith.constant 0.000000e+00 : f32
    %36 = vector.shape_cast %10 : vector<1x256xi1> to vector<1x256xi1>
    %37 = vector.broadcast %36 : vector<1x256xi1> to vector<16x256xi1>
    %38 = vector.broadcast %cst_19 : f32 to vector<16x256xf32>
    %39 = arith.select %37, %35, %38 : vector<16x256xi1>, vector<16x256xf32>
    %40 = vector.extract_strided_slice %15 {offsets = [0, 0, 0], sizes = [1, 16, 1], strides = [1, 1, 1]} : vector<9x16x1xf32> to vector<1x16x1xf32>
    %41 = vector.shape_cast %40 : vector<1x16x1xf32> to vector<16x1xf32>
    %42 = vector.broadcast %41 : vector<16x1xf32> to vector<16x256xf32>
    %43 = arith.mulf %34, %42 : vector<16x256xf32>
    %44 = vector.extract_strided_slice %15 {offsets = [1, 0, 0], sizes = [1, 16, 1], strides = [1, 1, 1]} : vector<9x16x1xf32> to vector<1x16x1xf32>
    %45 = vector.shape_cast %44 : vector<1x16x1xf32> to vector<16x1xf32>
    %46 = vector.broadcast %45 : vector<16x1xf32> to vector<16x256xf32>
    %47 = arith.mulf %29, %46 : vector<16x256xf32>
    %48 = arith.addf %43, %47 : vector<16x256xf32>
    %49 = vector.extract_strided_slice %15 {offsets = [2, 0, 0], sizes = [1, 16, 1], strides = [1, 1, 1]} : vector<9x16x1xf32> to vector<1x16x1xf32>
    %50 = vector.shape_cast %49 : vector<1x16x1xf32> to vector<16x1xf32>
    %51 = vector.broadcast %50 : vector<16x1xf32> to vector<16x256xf32>
    %52 = arith.mulf %39, %51 : vector<16x256xf32>
    %53 = arith.addf %48, %52 : vector<16x256xf32>
    %c16_i32 = arith.constant 16 : i32
    %54 = tpu.dynamic_rotate %53 by %c16_i32 dim 1 : vector<16x256xf32>, i32 -> vector<16x256xf32>
    %cst_20 = arith.constant 0.000000e+00 : f32
    %55 = vector.shape_cast %12 : vector<1x256xi1> to vector<1x256xi1>
    %56 = vector.broadcast %55 : vector<1x256xi1> to vector<16x256xi1>
    %57 = vector.broadcast %cst_20 : f32 to vector<16x256xf32>
    %58 = arith.select %56, %54, %57 : vector<16x256xi1>, vector<16x256xf32>
    %59 = vector.extract_strided_slice %15 {offsets = [3, 0, 0], sizes = [1, 16, 1], strides = [1, 1, 1]} : vector<9x16x1xf32> to vector<1x16x1xf32>
    %60 = vector.shape_cast %59 : vector<1x16x1xf32> to vector<16x1xf32>
    %61 = vector.broadcast %60 : vector<16x1xf32> to vector<16x256xf32>
    %62 = arith.mulf %34, %61 : vector<16x256xf32>
    %63 = vector.extract_strided_slice %15 {offsets = [4, 0, 0], sizes = [1, 16, 1], strides = [1, 1, 1]} : vector<9x16x1xf32> to vector<1x16x1xf32>
    %64 = vector.shape_cast %63 : vector<1x16x1xf32> to vector<16x1xf32>
    %65 = vector.broadcast %64 : vector<16x1xf32> to vector<16x256xf32>
    %66 = arith.mulf %29, %65 : vector<16x256xf32>
    %67 = arith.addf %62, %66 : vector<16x256xf32>
    %68 = vector.extract_strided_slice %15 {offsets = [5, 0, 0], sizes = [1, 16, 1], strides = [1, 1, 1]} : vector<9x16x1xf32> to vector<1x16x1xf32>
    %69 = vector.shape_cast %68 : vector<1x16x1xf32> to vector<16x1xf32>
    %70 = vector.broadcast %69 : vector<16x1xf32> to vector<16x256xf32>
    %71 = arith.mulf %39, %70 : vector<16x256xf32>
    %72 = arith.addf %67, %71 : vector<16x256xf32>
    %73 = arith.addf %58, %72 : vector<16x256xf32>
    %74 = vector.extract_strided_slice %15 {offsets = [6, 0, 0], sizes = [1, 16, 1], strides = [1, 1, 1]} : vector<9x16x1xf32> to vector<1x16x1xf32>
    %75 = vector.shape_cast %74 : vector<1x16x1xf32> to vector<16x1xf32>
    %76 = vector.broadcast %75 : vector<16x1xf32> to vector<16x256xf32>
    %77 = arith.mulf %34, %76 : vector<16x256xf32>
    %78 = vector.extract_strided_slice %15 {offsets = [7, 0, 0], sizes = [1, 16, 1], strides = [1, 1, 1]} : vector<9x16x1xf32> to vector<1x16x1xf32>
    %79 = vector.shape_cast %78 : vector<1x16x1xf32> to vector<16x1xf32>
    %80 = vector.broadcast %79 : vector<16x1xf32> to vector<16x256xf32>
    %81 = arith.mulf %29, %80 : vector<16x256xf32>
    %82 = arith.addf %77, %81 : vector<16x256xf32>
    %83 = vector.extract_strided_slice %15 {offsets = [8, 0, 0], sizes = [1, 16, 1], strides = [1, 1, 1]} : vector<9x16x1xf32> to vector<1x16x1xf32>
    %84 = vector.shape_cast %83 : vector<1x16x1xf32> to vector<16x1xf32>
    %85 = vector.broadcast %84 : vector<16x1xf32> to vector<16x256xf32>
    %86 = arith.mulf %39, %85 : vector<16x256xf32>
    %87 = arith.addf %82, %86 : vector<16x256xf32>
    %c240_i32 = arith.constant 240 : i32
    %88 = tpu.dynamic_rotate %87 by %c240_i32 dim 1 : vector<16x256xf32>, i32 -> vector<16x256xf32>
    %cst_21 = arith.constant 0.000000e+00 : f32
    %89 = vector.shape_cast %14 : vector<1x256xi1> to vector<1x256xi1>
    %90 = vector.broadcast %89 : vector<1x256xi1> to vector<16x256xi1>
    %91 = vector.broadcast %cst_21 : f32 to vector<16x256xf32>
    %92 = arith.select %90, %88, %91 : vector<16x256xi1>, vector<16x256xf32>
    %93 = arith.addf %73, %92 : vector<16x256xf32>
    %94 = vector.broadcast %17 : vector<16x1xf32> to vector<16x256xf32>
    %95 = arith.addf %93, %94 : vector<16x256xf32>
    %96 = arith.negf %95 : vector<16x256xf32>
    %97 = math.exp %96 : vector<16x256xf32>
    %cst_22 = arith.constant 1.000000e+00 : f32
    %98 = vector.broadcast %cst_22 : f32 to vector<16x256xf32>
    %99 = arith.addf %98, %97 : vector<16x256xf32>
    %100 = arith.divf %98, %99 : vector<16x256xf32>
    %101 = arith.mulf %95, %100 : vector<16x256xf32>
    %102 = arith.truncf %101 : vector<16x256xf32> to vector<16x256xbf16>
    %cst_23 = arith.constant dense<0.000000e+00> : vector<4x256xf32>
    %103 = tpu.matmul %18, %102, %cst_23 {dimension_numbers = #tpu.dot_dimension_numbers<[1], [0], [0], [1], [0, 0, 1, 1], [], []>} : vector<4x16xbf16>, vector<16x256xbf16>, vector<4x256xf32> -> vector<4x256xf32>
    %104 = arith.addf %19, %103 : vector<4x256xf32>
    %c0_24 = arith.constant 0 : index
    %c0_25 = arith.constant 0 : index
    %105 = vector.load %arg7[%c0_24, %c0_25] : memref<4x1xf32, #tpu.memory_space<vmem>>, vector<4x1xf32>
    %106 = vector.broadcast %105 : vector<4x1xf32> to vector<4x256xf32>
    %107 = arith.addf %104, %106 : vector<4x256xf32>
    %108 = arith.extf %1 : vector<4x256xbf16> to vector<4x256xf32>
    %109 = arith.addf %107, %108 : vector<4x256xf32>
    %110 = arith.truncf %109 : vector<4x256xf32> to vector<4x256xbf16>
    %c0_26 = arith.constant 0 : index
    %c0_27 = arith.constant 0 : index
    %c0_28 = arith.constant 0 : index
    %111 = vector.load %arg8[%c0_26, %c0_27, %c0_28] : memref<1x4x256xbf16, #tpu.memory_space<vmem>>, vector<1x4x256xbf16>
    %112 = vector.shape_cast %111 : vector<1x4x256xbf16> to vector<4x256xbf16>
    %113 = vector.shape_cast %110 : vector<4x256xbf16> to vector<1x4x256xbf16>
    tpu.vector_store %arg8[%c0_26, %c0_27, %c0_28], %113 {strides = array<i32>} : memref<1x4x256xbf16, #tpu.memory_space<vmem>>, vector<1x4x256xbf16>,
    return
  }
  func.func @transform_0(%arg0: i32) -> (i32, i32, i32) {
    %c0_i32 = arith.constant 0 : i32
    %c0_i32_0 = arith.constant 0 : i32
    %c0_i32_1 = arith.constant 0 : i32
    return %arg0, %c0_i32, %c0_i32_0 : i32, i32, i32
  }
  func.func @transform_1(%arg0: i32) -> (i32, i32) {
    %c0_i32 = arith.constant 0 : i32
    %c0_i32_0 = arith.constant 0 : i32
    %c0_i32_1 = arith.constant 0 : i32
    return %c0_i32, %c0_i32_0 : i32, i32
  }
  func.func @transform_2(%arg0: i32) -> (i32, i32) {
    %c0_i32 = arith.constant 0 : i32
    %c0_i32_0 = arith.constant 0 : i32
    %c0_i32_1 = arith.constant 0 : i32
    return %c0_i32, %c0_i32_0 : i32, i32
  }
  func.func @transform_3(%arg0: i32) -> (i32, i32, i32) {
    %c0_i32 = arith.constant 0 : i32
    %c0_i32_0 = arith.constant 0 : i32
    %c0_i32_1 = arith.constant 0 : i32
    %c0_i32_2 = arith.constant 0 : i32
    return %c0_i32, %c0_i32_0, %c0_i32_1 : i32, i32, i32
  }
  func.func @transform_4(%arg0: i32) -> (i32, i32) {
    %c0_i32 = arith.constant 0 : i32
    %c0_i32_0 = arith.constant 0 : i32
    %c0_i32_1 = arith.constant 0 : i32
    return %c0_i32, %c0_i32_0 : i32, i32
  }
  func.func @transform_5(%arg0: i32) -> (i32, i32) {
    %c0_i32 = arith.constant 0 : i32
    %c0_i32_0 = arith.constant 0 : i32
    %c0_i32_1 = arith.constant 0 : i32
    return %c0_i32, %c0_i32_0 : i32, i32
  }
  func.func @transform_6(%arg0: i32) -> (i32, i32) {
    %c0_i32 = arith.constant 0 : i32
    %c0_i32_0 = arith.constant 0 : i32
    %c0_i32_1 = arith.constant 0 : i32
    return %c0_i32, %c0_i32_0 : i32, i32
  }
  func.func @transform_7(%arg0: i32) -> (i32, i32, i32) {
    %c0_i32 = arith.constant 0 : i32
    %c0_i32_0 = arith.constant 0 : i32
    %c0_i32_1 = arith.constant 0 : i32
    return %arg0, %c0_i32, %c0_i32_0 : i32, i32, i32
  }
}

</mosaic_0001>

<bundles_post_ra>
// kernel: tpu_custom_call.1
= control target key start
LH: loop header
LB: loop body
LE: loop exit
PB: predicated region body
PF: predicated region fallthrough
CT: control target
= control target key end

     0   :  { %12 = vsyncpa [#allocation3], 0  ;;  %s1417_s0 = inlined_call_operand.vmem [shape: bf16[2,4,256], index: 0, kind: input, shape index: {}]   ;;  %s1418_s1 = inlined_call_operand.vmem [shape: bf16[16,4], index: 1, kind: input, shape index: {}]   ;;  %s1419_s2 = inlined_call_operand.vmem [shape: f32[16,1], index: 2, kind: input, shape index: {}]   ;;  %s1420_s3 = inlined_call_operand.vmem [shape: f32[9,16,1], index: 3, kind: input, shape index: {}]   ;;  %s1421_s4 = inlined_call_operand.vmem [shape: f32[16,1], index: 4, kind: input, shape index: {}]   ;;  %s1422_s5 = inlined_call_operand.vmem [shape: bf16[4,16], index: 5, kind: input, shape index: {}]   ;;  %s1423_s6 = inlined_call_operand.vmem [shape: f32[4,1], index: 6, kind: input, shape index: {}]   ;;  %s1424_s7 = inlined_call_operand.hbm [shape: bf16[2,4,256], index: 7, kind: output, shape index: {}]  }
   0x1   :  { %14 = vsyncpa [#allocation3 + $0x1], 0  ;;  %s1075_s24 = smov 0   ;;  %s1077_s25 = smov 0  }
   0x2   :  { %s1079_s26 = smov 0   ;;  %s1081_s27 = smov 0  }
   0x3 LB: > { %s1096_s28 = sadd.s32 4294967295, %s1026_s27   ;;  %s856_s29 = sadd.s32 4294967294, %s1026_s27   ;;  %s1026_s27 = sphi %s1081_s27, %s1442_s27   ;;  %s1022_s26 = sphi %s1079_s26, %s1441_s26   ;;  %s1018_s25 = sphi %s1077_s25, %s1440_s25   ;;  %s1014_s24 = sphi %s1075_s24, %s1439_s24  }
   0x4   : > { %s1100_s30 = sadd.s32 1, %s1026_s27   ;;  %s179_s8 = sadd.s32 1, %s1022_s26 }
   0x5   : > { %s176_s9 = ssub.s32 %s1026_s27, %s1100_s30  ;;  %p189_p0 = scmp.ne.s32.totalorder %s1022_s26, %s1018_s25 }
   0x6   : > { %p177_p1 = scmp.eq.s32.totalorder %s176_s9, 0  ;;  %p190_p2 = scmp.eq.s32.totalorder %s1096_s28, 1 }
   0x7   : > { %p195_p3 = scmp.ne.s32.totalorder %s1018_s25, %s1014_s24  ;;  %p196_p4 = scmp.eq.s32.totalorder %s856_s29, 1 }
   0x8   : > { %s1111_s10 = scalar_select %p177_p1, %s1022_s26, %s179_s8  }
   0x9   : > { %p1113_p5 = por %p190_p2, %p189_p0  ;;  %p1117_p6 = por %p196_p4, %p195_p3 }
   0xa   : > { %p859_p7 = scmp.ge.s32.totalorder %s1026_s27, 1  ;;  %p240_p8 = scmp.lt.s32.totalorder %s1026_s27, 3 }
   0xc   : > { %p241_p9 = pnand %p859_p7, %p240_p8 }
   0xd   : > { %p272_p10 = scmp.lt.s32.totalorder (!%p241_p9), %s1096_s28, 1  ;;  %v279_v0 = vlaneseq (!%p241_p9)  ;;  %v1028_v1 = vmov (!%p241_p9), 1983009808   ;;  %v1029_v3 = vmov (!%p241_p9), 0   ;;  %v312_v4 = vld [vmem:[%s1419_s2] sm:$0xff] (!%p241_p9)  ;;  %v313_v7 = vld [vmem:[%s1419_s2 + $0x8] sm:$0xff] (!%p241_p9) }
   0xe   : > { %244 = sbr.rel (%p241_p9) target bundleno = 812 (0x32c), region = 48  ;;  %v336_v2 = vunpack.c.l.s4 (!%p241_p9), %v1028_v1  ;;  %386 = vmatprep.mubr.bf16.mxu0 (!%p241_p9), %v1029_v3  ;;  %929 = vset.pattern.permute.xlu0 (!%p241_p9), %v1029_v3  ;;  %v294_v8 = vld [vmem:[%s1420_s3] sm:$0xff] (!%p241_p9)  ;;  %vm347_vm0 = vcmask (!%p241_p9), 1041408   ;;  %v295_v11 = vld [vmem:[%s1420_s3 + $0x8] sm:$0xff] (!%p241_p9)  ;;  %v296_v13 = vld [vmem:[%s1420_s3 + $0x10] sm:$0xff] (!%p241_p9)  ;;  %vm343_vm1 = vcmask (!%p241_p9), 31744  }
   0xf   : > { %v339_v5 = vshrl.u32 (!%p241_p9), %v279_v0, 7  ;;  %321 = vperm.xlu0 (!%p241_p9), %929, %v312_v4   ;;  %930 = vset.pattern.permute.xlu1 (!%p241_p9), %v1029_v3  ;;  %v297_v16 = vld [vmem:[%s1420_s3 + $0x18] sm:$0xff] (!%p241_p9)  ;;  %v931_v17 = vld [vmem:[%s1418_s1] sm:$0xff] (!%p241_p9)   ;;  %v299_v19 = vld [vmem:[%s1420_s3 + $0x28] sm:$0xff] (!%p241_p9)  ;;  %s1030_s20 = smov (!%p241_p9), 1   ;;  %s1031_s21 = smov (!%p241_p9), 127  }
  0x10   : > { %v337_v6 = vunpack.c.0.s8 (!%p241_p9), %v336_v2  ;;  %753 = vmatprep.mubr.bf16.mxu1 (!%p241_p9), %v1029_v3  ;;  %469 = vperm.xlu1 (!%p241_p9), %930, %v294_v8   ;;  %v298_v18 = vld [vmem:[%s1420_s3 + $0x20] sm:$0xff] (!%p241_p9)  ;;  %v307_v21 = vld [vmem:[%s1420_s3 + $0x68] sm:$0xff] (!%p241_p9)  ;;  %v308_v22 = vld [vmem:[%s1420_s3 + $0x70] sm:$0xff] (!%p241_p9)  ;;  %s1032_s29 = smov (!%p241_p9), 16   ;;  %s1033_s8 = smov (!%p241_p9), 112   ;;  %vm717_vm14 = vcmask (!%p241_p9), 130048  }
  0x11   : > { %v306_v20 = vld [vmem:[%s1420_s3 + $0x60] sm:$0xff] (!%p241_p9)  ;;  %v309_v23 = vld [vmem:[%s1420_s3 + $0x78] sm:$0xff] (!%p241_p9)  ;;  %v311_v25 = vld [vmem:[%s1420_s3 + $0x88] sm:$0xff] (!%p241_p9)  ;;  %s269_s16 = sand.u32 (!%p241_p9), 1, %s1018_s25  }
  0x12   : > { %v340_v9 = vsub.s32 (!%p241_p9), %v337_v6, %v339_v5  ;;  %v310_v24 = vld [vmem:[%s1420_s3 + $0x80] sm:$0xff] (!%p241_p9)  ;;  %v300_v56 = vld [vmem:[%s1420_s3 + $0x30] sm:$0xff] (!%p241_p9)  ;;  %v301_v57 = vld [vmem:[%s1420_s3 + $0x38] sm:$0xff] (!%p241_p9)  ;;  %s860_s17 = sshll.u32 (!%p241_p9), %s269_s16, 2 }
  0x13   : > { %326 = vperm.xlu0 (!%p241_p9), %929, %v313_v7   ;;  %v302_v58 = vld [vmem:[%s1420_s3 + $0x40] sm:$0xff] (!%p241_p9)  ;;  %v303_v59 = vld [vmem:[%s1420_s3 + $0x48] sm:$0xff] (!%p241_p9)  ;;  %v304_v60 = vld [vmem:[%s1420_s3 + $0x50] sm:$0xff] (!%p241_p9)  ;;  %s271_s19 = scalar_lea.vmem (!%p241_p9), [#allocation2], %s860_s17 }
  0x14   : > { %474 = vperm.xlu1 (!%p241_p9), %930, %v295_v11   ;;  %v305_v61 = vld [vmem:[%s1420_s3 + $0x58] sm:$0xff] (!%p241_p9)  ;;  %v314_v62 = vld [vmem:[%s1421_s4] sm:$0xff] (!%p241_p9)  ;;  %v315_v63 = vld [vmem:[%s1421_s4 + $0x8] sm:$0xff] (!%p241_p9) }
  0x15   : > { %s273_s15 = scalar_select %p272_p10, %s1096_s28, 1 }
  0x17   : > { %s882_s18 = sshll.u32 %s273_s15, 2  ;;  %483 = vperm.xlu0 %929, %v296_v13  }
  0x18   : > { %s276_s23 = scalar_lea.vmem %s1417_s0, %s882_s18  ;;  %488 = vperm.xlu1 %930, %v297_v16   ;;  %s883_s18 = sshll.u32 %s1096_s28, 6 }
  0x19   : > { %v1138_v10 = vld [vmem:[%s276_s23] sm:$0xf]  ;;  %s1375_s23 = scalar_lea.hbm %s1424_s7, %s883_s18  ;;  %s1034_s28 = smov [#allocation2]  }
  0x1a   : > { %v341_v12 = vrot.slane %v1138_v10, %v340_v9  ;;  %s968_s9 = sshll.u32 %s1034_s28, 4  ;;  %s969_s9 = int_to_ptr.vmem [resolvable:$false] %s968_s9 }
  0x1b   : > { %501 = vperm.xlu0 %929, %v298_v18   ;;  %s970_s13 = scalar_lea.vmem %s969_s9, 128 }
  0x1c   : > { %v342_v14 = vcombine.high %v341_v12, %v341_v12  ;;  %v349_v15 = vsel %vm347_vm0, %v341_v12, 0  ;;  %506 = vperm.xlu1 %930, %v299_v19  }
  0x1e   : > { %864 = vmatprep.subr.msk.bf16.mxu0 %vm347_vm0, %v342_v14  ;;  %v1230_v14 = vand.u32 127, %v279_v0 }
  0x1f   : > { %355 = vmatpush1.bf16.msra.mxu0 %v349_v15  ;;  %594 = vperm.xlu0 %929, %v306_v20  }
  0x20   : > { %599 = vperm.xlu1 %930, %v307_v21   ;;  %v282_v18 = vand.u32 15, %v1230_v14  ;;  %vm433_vm2 = vcmp.lt.s32.totalorder %v1230_v14, 1  ;;  %vm454_vm4 = vcmp.lt.s32.totalorder %v1230_v14, 127  ;;  %vm525_vm8 = vcmp.lt.s32.totalorder %v1230_v14, 16 }
  0x21   : > { %vm650_vm11 = vcmp.lt.s32.totalorder %v1230_v14, 112 }
  0x22   : > { %865 = vmatmul.mubr.msk.bf16.vlgmr.msra.gmra.mrb[0].mxu0 %vm343_vm1, %v931_v17  ;;  %v1233_v17 = vadd.s32 128, %v1230_v14  ;;  %vm286_vm3 = vcmp.ge.s32.totalorder %v282_v18, 1  ;;  %vm1241_vm6 = vcmp.le.s32.totalorder %v282_v18, 14 }
  0x23   : > { %608 = vperm.xlu0 %929, %v308_v22  }
  0x24   : > { %613 = vperm.xlu1 %930, %v309_v23   ;;  %v283_v21 = vand.u32 15, %v1233_v17 }
  0x26   : > { %vm287_vm5 = vcmp.ge.s32.totalorder %v283_v21, 1  ;;  %vm1245_vm7 = vcmp.le.s32.totalorder %v283_v21, 14 }
  0x27   : > { %626 = vperm.xlu0 %929, %v310_v24  }
  0x28   : > { %631 = vperm.xlu1 %930, %v311_v25  }
  0x8e   : > { %v322_v26 = vpop.permute.xlu0 %321 }
  0x8f   : > { %v470_v1 = vpop.permute.xlu1 %469 }
  0x92   : > { %v327_v30 = vpop.permute.xlu0 %326 }
  0x93   : > { %v475_v2 = vpop.permute.xlu1 %474 }
  0x96   : > { %v484_v3 = vpop.permute.xlu0 %483 }
  0x97   : > { %v489_v4 = vpop.permute.xlu1 %488 }
  0x9a   : > { %v502_v5 = vpop.permute.xlu0 %501 }
  0x9b   : > { %v507_v6 = vpop.permute.xlu1 %506 }
  0x9e   : > { %v1217_v7 = vpop.permute.xlu0 %594 }
  0x9f   : > { %v1219_v8 = vpop.permute.xlu1 %599 }
  0xa2   : > { %v1221_v9 = vpop.permute.xlu0 %608 }
  0xa3   : > { %v1223_v11 = vpop.permute.xlu1 %613 }
  0xa6   : > { %v1225_v12 = vpop.permute.xlu0 %626 }
  0xa7   : > { %v1227_v13 = vpop.permute.xlu1 %631 }
  0xf5   : > { %v388_v27 = vpop.f32.mrb[0].mxu0 }
  0xf6   : > { %v389_v28 = vadd.f32 %v388_v27, %v322_v26  ;;  %v390_v29 = vpop.f32.mrb[1].mxu0 }
  0xf7   : > { %v391_v31 = vadd.f32 %v390_v29, %v322_v26  ;;  %v392_v32 = vpop.f32.mrb[2].mxu0 }
  0xf8   : > { %v866_v33 = vmul.f32 -1.442695, %v389_v28  ;;  %v393_v34 = vadd.f32 %v392_v32, %v327_v30  ;;  %v394_v35 = vpop.f32.mrb[3].mxu0 }
  0xf9   : > { %v867_v36 = vmul.f32 -1.442695, %v391_v31  ;;  %v395_v37 = vadd.f32 %v394_v35, %v327_v30 }
  0xfa   : > { %932 = vpow2.f32 %v866_v33  ;;  %v868_v38 = vmul.f32 -1.442695, %v393_v34 }
  0xfb   : > { %934 = vpow2.f32 %v867_v36  ;;  %v869_v39 = vmul.f32 -1.442695, %v395_v37 }
  0xfc   : > { %936 = vpow2.f32 %v868_v38 }
  0xfd   : > { %938 = vpow2.f32 %v869_v39 }
 0x104   : > { %v933_v40 = vpop.eup %932 }
 0x105   : > { %v935_v41 = vpop.eup %934  ;;  %v409_v42 = vadd.f32 1.0, %v933_v40 }
 0x106   : > { %v937_v43 = vpop.eup %936  ;;  %v410_v46 = vadd.f32 1.0, %v935_v41 }
 0x107   : > { %940 = vrcp.f32 %v409_v42  ;;  %v411_v44 = vadd.f32 1.0, %v937_v43  ;;  %v939_v45 = vpop.eup %938 }
 0x108   : > { %v412_v47 = vadd.f32 1.0, %v939_v45 }
 0x109   : > { %942 = vrcp.f32 %v411_v44 }
 0x10a   : > { %944 = vrcp.f32 %v410_v46 }
 0x10b   : > { %946 = vrcp.f32 %v412_v47 }
 0x111   : > { %v941_v48 = vpop.eup %940 }
 0x112   : > { %v1177_v49 = vmul.f32 %v941_v48, %v389_v28 }
 0x113   : > { %v943_v50 = vpop.eup %942 }
 0x114   : > { %v1179_v51 = vmul.f32 %v943_v50, %v393_v34  ;;  %425 = vrot.lane.b32.xlu0 %v1177_v49, %s1030_s20  ;;  %v945_v52 = vpop.eup %944  ;;  %v491_v38 = vmul.f32 %v484_v3, %v1177_v49 }
 0x115   : > { %v947_v53 = vpop.eup %946  ;;  %v1184_v54 = vmul.f32 %v945_v52, %v391_v31 }
 0x116   : > { %427 = vrot.lane.b32.xlu1 %v1179_v51, %s1030_s20  ;;  %v1187_v55 = vmul.f32 %v947_v53, %v395_v37  ;;  %v493_v43 = vmul.f32 %v489_v4, %v1179_v51 }
 0x118   : > { %446 = vrot.lane.b32.xlu0 %v1177_v49, %s1031_s21 }
 0x11a   : > { %448 = vrot.lane.b32.xlu1 %v1179_v51, %s1031_s21 }
 0x11c   : > { %429 = vrot.lane.b32.xlu0 %v1184_v54, %s1030_s20 }
 0x11e   : > { %431 = vrot.lane.b32.xlu1 %v1187_v55, %s1030_s20  ;;  %s797_s20 = sshll.u32 %s271_s19, 4  ;;  %s1377_s20 = int_to_ptr.vmem [resolvable:$true] %s797_s20 }
 0x11f   : > { %p971_p0 = scmp.lt.s32.totalorder %s1377_s20, %s969_s9 }
 0x120   : > { %450 = vrot.lane.b32.xlu0 %v1184_v54, %s1031_s21 }
 0x122   : > { %452 = vrot.lane.b32.xlu1 %v1187_v55, %s1031_s21 }
 0x124   : > { %540 = vperm.xlu0 %929, %v300_v56  }
 0x126   : > { %545 = vperm.xlu1 %930, %v301_v57  }
 0x128   : > { %554 = vperm.xlu0 %929, %v302_v58  }
 0x12a   : > { %559 = vperm.xlu1 %930, %v303_v59   ;;  %v492_v59 = vmul.f32 %v484_v3, %v1184_v54 }
 0x12c   : > { %572 = vperm.xlu0 %929, %v304_v60   ;;  %v494_v60 = vmul.f32 %v489_v4, %v1187_v55  ;;  %v616_v4 = vmul.f32 %v1221_v9, %v1177_v49 }
 0x12e   : > { %577 = vperm.xlu1 %930, %v305_v61  }
 0x130   : > { %669 = vperm.xlu0 %929, %v314_v62  }
 0x132   : > { %674 = vperm.xlu1 %930, %v315_v63  }
 0x186   : > { %v426_v15 = vpop.permute.xlu0 %425 }
 0x188   : > { %v428_v16 = vpop.permute.xlu1 %427 }
 0x18a   : > { %v447_v19 = vpop.permute.xlu0 %446 }
 0x18c   : > { %v449_v20 = vpop.permute.xlu1 %448 }
 0x18e   : > { %v430_v22 = vpop.permute.xlu0 %429 }
 0x18f   : > { %v436_v23 = vsel %vm433_vm2, %v430_v22, %v426_v15  ;;  %v434_v25 = vsel %vm433_vm2, %v426_v15, %v430_v22 }
 0x190   : > { %v1238_v24 = vsel %vm286_vm3, %v436_v23, 0.0  ;;  %v432_v0 = vpop.permute.xlu1 %431  ;;  %v1256_v35 = vsel %vm287_vm5, %v434_v25, 0.0  ;;  %v617_v25 = vmul.f32 %v1221_v9, %v1184_v54 }
 0x191   : > { %v435_v26 = vsel %vm433_vm2, %v428_v16, %v432_v0  ;;  %v437_v27 = vsel %vm433_vm2, %v432_v0, %v428_v16  ;;  %v477_v31 = vmul.f32 %v470_v1, %v1238_v24  ;;  %v478_v46 = vmul.f32 %v470_v1, %v1256_v35 }
 0x192   : > { %v451_v30 = vpop.permute.xlu0 %450  ;;  %v1250_v32 = vsel %vm286_vm3, %v437_v27, 0.0  ;;  %v1260_v39 = vsel %vm287_vm5, %v435_v26, 0.0  ;;  %v602_v63 = vmul.f32 %v1217_v7, %v1238_v24  ;;  %v619_v26 = vmul.f32 %v1223_v11, %v1187_v55 }
 0x193   : > { %v455_v33 = vsel %vm454_vm4, %v447_v19, %v451_v30  ;;  %v457_v34 = vsel %vm454_vm4, %v451_v30, %v447_v19  ;;  %v479_v36 = vmul.f32 %v475_v2, %v1250_v32  ;;  %v495_v50 = vadd.f32 %v491_v38, %v477_v31 }
 0x194   : > { %v453_v37 = vpop.permute.xlu1 %452  ;;  %v1264_v40 = vsel %vm1241_vm6, %v455_v33, 0.0  ;;  %v1273_v44 = vsel %vm1245_vm7, %v457_v34, 0.0  ;;  %v480_v52 = vmul.f32 %v475_v2, %v1260_v39  ;;  %v496_v1 = vadd.f32 %v492_v59, %v478_v46 }
 0x195   : > { %v456_v41 = vsel %vm454_vm4, %v449_v20, %v453_v37  ;;  %v458_v42 = vsel %vm454_vm4, %v453_v37, %v449_v20  ;;  %v509_v45 = vmul.f32 %v502_v5, %v1264_v40  ;;  %v497_v56 = vadd.f32 %v493_v43, %v479_v36 }
 0x196   : > { %v1279_v47 = vsel %vm1241_vm6, %v456_v41, 0.0  ;;  %v1283_v48 = vsel %vm1245_vm7, %v458_v42, 0.0  ;;  %v510_v57 = vmul.f32 %v502_v5, %v1273_v44  ;;  %v604_v2 = vmul.f32 %v1219_v8, %v1250_v32 }
 0x197   : > { %v511_v53 = vmul.f32 %v507_v6, %v1279_v47  ;;  %v513_v58 = vadd.f32 %v509_v45, %v495_v50  ;;  %v512_v61 = vmul.f32 %v507_v6, %v1283_v48  ;;  %v498_v15 = vadd.f32 %v494_v60, %v480_v52 }
 0x198   : > { %v634_v5 = vmul.f32 %v1225_v12, %v1264_v40  ;;  %v514_v3 = vadd.f32 %v510_v57, %v496_v1  ;;  %v618_v6 = vmul.f32 %v1223_v11, %v1179_v51  ;;  %v636_v16 = vmul.f32 %v1227_v13, %v1279_v47 }
 0x199   : > { %v515_v62 = vadd.f32 %v511_v53, %v497_v56  ;;  %517 = vrot.lane.b32.xlu0 %v513_v58, %s1032_s29  ;;  %v516_v18 = vadd.f32 %v512_v61, %v498_v15  ;;  %v603_v19 = vmul.f32 %v1217_v7, %v1256_v35  ;;  %v620_v20 = vadd.f32 %v616_v4, %v602_v63 }
 0x19a   : > { %v605_v21 = vmul.f32 %v1219_v8, %v1260_v39  ;;  %v622_v22 = vadd.f32 %v618_v6, %v604_v2  ;;  %v635_v23 = vmul.f32 %v1225_v12, %v1273_v44  ;;  %v637_v7 = vmul.f32 %v1227_v13, %v1283_v48  ;;  %v711_v13 = vld [vmem:[%s1423_s6] sm:$0xf] }
 0x19b   : > { %519 = vrot.lane.b32.xlu1 %v515_v62, %s1032_s29  ;;  %v638_v0 = vadd.f32 %v634_v5, %v620_v20  ;;  %v621_v8 = vadd.f32 %v617_v25, %v603_v19  ;;  %v284_v61 = vshra.s32 %v1230_v14, 4 }
 0x19c   : > { %v640_v27 = vadd.f32 %v636_v16, %v622_v22  ;;  %v623_v29 = vadd.f32 %v619_v26, %v605_v21 }
 0x19d   : > { %521 = vrot.lane.b32.xlu0 %v514_v3, %s1032_s29  ;;  %v639_v31 = vadd.f32 %v635_v23, %v621_v8  ;;  %vm1333_vm9 = vcmp.ge.s32.totalorder %v284_v61, 1  ;;  %vm1350_vm12 = vcmp.le.s32.totalorder %v284_v61, 14  ;;  %v762_v61 = vunpack.c.l.bf16 %v1138_v10 }
 0x19e   : > { %v641_v12 = vadd.f32 %v637_v7, %v623_v29 }
 0x19f   : > { %523 = vrot.lane.b32.xlu1 %v516_v18, %s1032_s29  ;;  %s783_s29 = scalar_lea.sflag [#allocation3], %s269_s16 }
 0x1a1   : > { %642 = vrot.lane.b32.xlu0 %v638_v0, %s1033_s8 }
 0x1a3   : > { %v541_v28 = vpop.permute.xlu0 %540  ;;  %644 = vrot.lane.b32.xlu1 %v640_v27, %s1033_s8 }
 0x1a4   : > { %v548_v36 = vmul.f32 %v541_v28, %v1238_v24  ;;  %v549_v37 = vmul.f32 %v541_v28, %v1256_v35 }
 0x1a5   : > { %v546_v30 = vpop.permute.xlu1 %545  ;;  %646 = vrot.lane.b32.xlu0 %v639_v31, %s1033_s8 }
 0x1a6   : > { %v550_v42 = vmul.f32 %v546_v30, %v1250_v32  ;;  %v551_v43 = vmul.f32 %v546_v30, %v1260_v39 }
 0x1a7   : > { %v555_v33 = vpop.permute.xlu0 %554  ;;  %648 = vrot.lane.b32.xlu1 %v641_v12, %s1033_s8  ;;  %s964_s8 = scalar_lea.vmem %s1377_s20, 64 }
 0x1a8   : > { %v562_v9 = vmul.f32 %v555_v33, %v1177_v49  ;;  %v563_v11 = vmul.f32 %v555_v33, %v1184_v54  ;;  %p965_p11 = scmp.ne.s32.totalorder %s1377_s20, %s964_s8  ;;  %p972_p1 = scmp.lt.s32.totalorder %s970_s13, %s964_s8 }
 0x1a9   : > { %v560_v34 = vpop.permute.xlu1 %559  ;;  %714 = vperm.xlu0 %929, %v711_v13  }
 0x1aa   : > { %v564_v38 = vmul.f32 %v560_v34, %v1179_v51  ;;  %v565_v41 = vmul.f32 %v560_v34, %v1187_v55  ;;  %v566_v54 = vadd.f32 %v562_v9, %v548_v36  ;;  %v567_v45 = vadd.f32 %v563_v11, %v549_v37  ;;  %p966_p12 = pnand %p965_p11, %p1113_p5  ;;  %p973_p2 = por %p972_p1, %p971_p0 }
 0x1ab   : > { %v573_v49 = vpop.permute.xlu0 %572 }
 0x1ac   : > { %v580_v46 = vmul.f32 %v573_v49, %v1264_v40  ;;  %v581_v50 = vmul.f32 %v573_v49, %v1273_v44  ;;  %v568_v52 = vadd.f32 %v564_v38, %v550_v42  ;;  %v569_v24 = vadd.f32 %v565_v41, %v551_v43  ;;  %p967_p13 = pneg %p966_p12 }
 0x1ad   : > { %v578_v53 = vpop.permute.xlu1 %577  ;;  %v285_v40 = vshra.s32 %v1233_v17, 4 }
 0x1ae   : > { %v584_v35 = vadd.f32 %v580_v46, %v566_v54  ;;  %v585_v56 = vadd.f32 %v581_v50, %v567_v45  ;;  %v582_v51 = vmul.f32 %v578_v53, %v1279_v47  ;;  %v583_v55 = vmul.f32 %v578_v53, %v1283_v48  ;;  %p974_p3 = pnand %p973_p2, %p967_p13 }
 0x1af   : > { %v670_v39 = vpop.permute.xlu0 %669  ;;  %vm1337_vm10 = vcmp.ge.s32.totalorder %v285_v40, 1  ;;  %vm1354_vm13 = vcmp.le.s32.totalorder %v285_v40, 14 }
 0x1b0   : > { %v586_v32 = vadd.f32 %v582_v51, %v568_v52  ;;  %v587_v57 = vadd.f32 %v583_v55, %v569_v24 }
 0x1b1   : > { %v675_v58 = vpop.permute.xlu1 %674 }
 0x20b   : > { %v518_v59 = vpop.permute.xlu0 %517 }
 0x20d   : > { %v520_v60 = vpop.permute.xlu1 %519 }
 0x20f   : > { %v522_v44 = vpop.permute.xlu0 %521 }
 0x210   : > { %v526_v48 = vsel %vm525_vm8, %v518_v59, %v522_v44  ;;  %v528_v1 = vsel %vm525_vm8, %v522_v44, %v518_v59 }
 0x211   : > { %v524_v62 = vpop.permute.xlu1 %523  ;;  %v534_v17 = vsel %vm1333_vm9, %v528_v1, 0.0  ;;  %v535_v3 = vsel %vm1337_vm10, %v526_v48, 0.0 }
 0x212   : > { %v527_v2 = vsel %vm525_vm8, %v520_v60, %v524_v62  ;;  %v529_v15 = vsel %vm525_vm8, %v524_v62, %v520_v60  ;;  %v588_v20 = vadd.f32 %v584_v35, %v534_v17  ;;  %v589_v21 = vadd.f32 %v585_v56, %v535_v3  ;;  %v316_v60 = vld [vmem:[%s1422_s5] sm:$0x3] }
 0x213   : > { %v643_v5 = vpop.permute.xlu0 %642  ;;  %v536_v6 = vsel %vm1333_vm9, %v529_v15, 0.0  ;;  %v537_v16 = vsel %vm1337_vm10, %v527_v2, 0.0  ;;  %v764_v62 = vcombine.high %v762_v61, %v762_v61 }
 0x214   : > { %v590_v23 = vadd.f32 %v586_v32, %v536_v6  ;;  %v591_v0 = vadd.f32 %v587_v57, %v537_v16 }
 0x215   : > { %v645_v4 = vpop.permute.xlu1 %644 }
 0x217   : > { %v647_v22 = vpop.permute.xlu0 %646 }
 0x218   : > { %v651_v25 = vsel %vm650_vm11, %v643_v5, %v647_v22  ;;  %v653_v26 = vsel %vm650_vm11, %v647_v22, %v643_v5 }
 0x219   : > { %v649_v7 = vpop.permute.xlu1 %648  ;;  %v659_v27 = vsel %vm1350_vm12, %v651_v25, 0.0  ;;  %v660_v14 = vsel %vm1354_vm13, %v653_v26, 0.0 }
 0x21a   : > { %v652_v28 = vsel %vm650_vm11, %v645_v4, %v649_v7  ;;  %v654_v8 = vsel %vm650_vm11, %v649_v7, %v645_v4  ;;  %v663_v29 = vadd.f32 %v659_v27, %v588_v20  ;;  %v664_v30 = vadd.f32 %v660_v14, %v589_v21 }
 0x21b   : > { %v661_v31 = vsel %vm1350_vm12, %v652_v28, 0.0  ;;  %v662_v12 = vsel %vm1354_vm13, %v654_v8, 0.0 }
 0x21c   : > { %v665_v33 = vadd.f32 %v661_v31, %v590_v23  ;;  %v666_v9 = vadd.f32 %v662_v12, %v591_v0  ;;  %v678_v11 = vadd.f32 %v670_v39, %v664_v30  ;;  %v677_v13 = vadd.f32 %v670_v39, %v663_v29 }
 0x21e   : > { %v680_v34 = vadd.f32 %v675_v58, %v666_v9  ;;  %v679_v36 = vadd.f32 %v675_v58, %v665_v33  ;;  %v871_v37 = vmul.f32 -1.442695, %v678_v11  ;;  %v870_v38 = vmul.f32 -1.442695, %v677_v13 }
 0x220   : > { %v873_v41 = vmul.f32 -1.442695, %v680_v34  ;;  %v872_v42 = vmul.f32 -1.442695, %v679_v36  ;;  %948 = vpow2.f32 %v871_v37 }
 0x222   : > { %950 = vpow2.f32 %v873_v41 }
 0x223   : > { %952 = vpow2.f32 %v870_v38 }
 0x224   : > { %954 = vpow2.f32 %v872_v42 }
 0x228   : > { %v715_v40 = vpop.permute.xlu0 %714 }
 0x22a   : > { %v949_v43 = vpop.eup %948 }
 0x22b   : > { %v694_v54 = vadd.f32 1.0, %v949_v43 }
 0x22c   : > { %v951_v49 = vpop.eup %950 }
 0x22d   : > { %v953_v45 = vpop.eup %952  ;;  %v696_v46 = vadd.f32 1.0, %v951_v49  ;;  %956 = vrcp.f32 %v694_v54 }
 0x22e   : > { %v955_v50 = vpop.eup %954  ;;  %v693_v52 = vadd.f32 1.0, %v953_v45 }
 0x22f   : > { %958 = vrcp.f32 %v696_v46  ;;  %v695_v24 = vadd.f32 1.0, %v955_v50 }
 0x230   : > { %960 = vrcp.f32 %v693_v52 }
 0x231   : > { %962 = vrcp.f32 %v695_v24 }
 0x237   : > { %v957_v53 = vpop.eup %956 }
 0x238   : > { %v706_v51 = vmul.f32 %v957_v53, %v678_v11 }
 0x239   : > { %v959_v35 = vpop.eup %958 }
 0x23a   : > { %v961_v56 = vpop.eup %960  ;;  %v708_v55 = vmul.f32 %v959_v35, %v680_v34 }
 0x23b   : > { %v963_v32 = vpop.eup %962  ;;  %v705_v39 = vmul.f32 %v961_v56, %v677_v13 }
 0x23c   : > { %v710_v57 = vpack.c.bf16 %v708_v55, %v706_v51  ;;  %v707_v58 = vmul.f32 %v963_v32, %v679_v36 }
 0x23e   : > { %721 = vmatprep.subr.bf16.mxu1 %v710_v57  ;;  %v709_v59 = vpack.c.bf16 %v707_v58, %v705_v39 }
 0x240   : > { %722 = vmatpush1.bf16.msra.mxu1 %v709_v59 }
 0x243   : > { %874 = vmatmul.mubr.msk.bf16.vlgmr.msra.gmra.mrb[0].mxu1 %vm717_vm14, %v316_v60 }
 0x316   : > { %v755_v44 = vpop.f32.mrb[0].mxu1 }
 0x317   : > { %v756_v63 = vadd.f32 %v755_v44, %v715_v40  ;;  %v757_v47 = vpop.f32.mrb[1].mxu1 }
 0x318   : > { %v758_v48 = vadd.f32 %v757_v47, %v715_v40  ;;  %v759_v1 = vpop.f32.mrb[2].mxu1 }
 0x319   : > { %v766_v2 = vadd.f32 %v762_v61, %v756_v63  ;;  %v760_v15 = vpop.f32.mrb[3].mxu1 }
 0x31a   : > { %v767_v5 = vadd.f32 %v764_v62, %v758_v48 }
 0x31c   : > { %v875_v17 = vpack.c.bf16 %v767_v5, %v766_v2 }
 0x31e   : > { %876 = vst.sshfl [vmem:[%s271_s19] sm:$0x33 pattern:$0x76325410] %v875_v17 }
 0x31f   : > { %977 = shalt.err (!%p974_p3)
}
 0x320   : > { %s978_s14 = scalar_lea.hbm %s1375_s23, 64  ;;  %s982_s17 = scalar_lea.hbm %s1424_s7, 128 }
 0x321   : > { %p979_p4 = scmp.ne.s32.totalorder %s1375_s23, %s978_s14  ;;  %p983_p9 = scmp.lt.u32.totalorder %s1375_s23, %s1424_s7 }
 0x322   : > { %p984_p10 = scmp.lt.u32.totalorder %s982_s17, %s978_s14  ;;  %p986_p12 = scmp.lt.u32.totalorder %s978_s14, %s1375_s23 }
 0x323   : > { %p980_p7 = pnand %p979_p4, %p1113_p5 }
 0x324   : > { %p985_p11 = por %p984_p10, %p983_p9 }
 0x325   : > { %p981_p8 = pneg %p980_p7 }
 0x326   : > { %p987_p13 = por %p986_p12, %p985_p11 }
 0x328   : > { %p988_p0 = pnand %p987_p13, %p981_p8 }
 0x32a   : > { %991 = shalt.err (!%p988_p0)
}
 0x32b   : > { %884 = dma.vmem_to_hbm [thread:$0]  (%p1113_p5), %s1377_s20, 64, %s1375_s23, %s783_s29  }
 0x32c PF: > { %p890_p1 = scmp.ge.s32.totalorder %s1026_s27, 2  ;;  %s809_s21 = sand.u32 1, %s1014_s24  }
 0x32d   : > { %s810_s22 = scalar_lea.sflag [#allocation3], %s809_s21 }
 0x32e   : > { %p887_p2 = pnand %p890_p1, %p1117_p6 }
 0x330   : > { %1009 = dma.done.wait (!%p887_p2), %s810_s22, 64  }
 0x331   : > { %1011 = vsyncadd (!%p887_p2), %s810_s22, 4294967232  ;;  %p17_p3 = scmp.ge.s32.totalorder %s1100_s30, 4   ;;  %s1439_s24 = smov %s1018_s25 }
 0x332   : > { %s1440_s25 = smov %s1022_s26  ;;  %s1441_s26 = smov %s1111_s10 }
 0x333   : > { %s1442_s27 = smov %s1100_s30  ;;  %19 = sbr.rel (!%p17_p3) target bundleno = 3 (0x3), region = 83 }
 0x33a   :  { %815 = vsyncpa [#allocation3], 1 }
 0x33b   :  { %817 = vsyncpa [#allocation3 + $0x1], 1 }

</bundles_post_ra>
